<compile_context>
chip_gen: v5e
topology: v5e:2x2
jax: 0.10.0
libtpu: 0.0.40
codegen_flags: <defaults>
</compile_context>

<pallas_src>
import jax
import jax.numpy as jnp
from jax.experimental import pallas as pl
from jax.experimental.pallas import tpu as pltpu

_EPS = 1e-5  # PyTorch BatchNorm1d default eps

# Feature widths and static offsets into the packed (bias/gamma/beta) column.
_F1, _F2, _F3 = 32, 64, 8
_OFF_B1, _OFF_G1, _OFF_BE1 = 0, 32, 64
_OFF_B2, _OFF_G2, _OFF_BE2 = 96, 160, 224
_OFF_B3, _OFF_G3, _OFF_BE3 = 288, 296, 304
_OFF_B4 = 312                      # b4 length = latent_size (last slice)


def _encoder_kernel(x_ref, w1_ref, w2_ref, w3_ref, w4_ref, pv_ref, out_ref):
    batch = x_ref.shape[-1]                # static
    latent = out_ref.shape[0]              # static
    inv_b = 1.0 / batch

    pv = pv_ref[...]                       # (312 + latent, 1), loaded once

    def col(off, size):
        # static sublane slice (all offsets are multiples of 8)
        return pv[off:off + size, :]       # (size, 1) -> broadcasts over lanes

    def linear_relu(w_ref, h, b):
        # (out_f, in_f) @ (in_f, B) -> (out_f, B); batch fills the MXU N lanes
        z = jnp.dot(w_ref[...], h, preferred_element_type=jnp.float32) + b
        return jnp.maximum(z, 0.0)

    def batchnorm(h, g, be):
        # One-pass stats: the two lane (XLU) reductions are independent.
        s = jnp.sum(h, axis=-1, keepdims=True)          # (f, 1)
        s2 = jnp.sum(h * h, axis=-1, keepdims=True)     # (f, 1)
        mean = s * inv_b
        var = jnp.maximum(s2 * inv_b - mean * mean, 0.0)  # biased variance
        inv = jax.lax.rsqrt(var + _EPS)
        return (h - mean) * (inv * g) + be

    h = x_ref[...]                                       # (12, B)
    h = linear_relu(w1_ref, h, col(_OFF_B1, _F1))        # (32, B)
    h = batchnorm(h, col(_OFF_G1, _F1), col(_OFF_BE1, _F1))
    h = linear_relu(w2_ref, h, col(_OFF_B2, _F2))        # (64, B)
    h = batchnorm(h, col(_OFF_G2, _F2), col(_OFF_BE2, _F2))
    h = linear_relu(w3_ref, h, col(_OFF_B3, _F3))        # (8, B)
    h = batchnorm(h, col(_OFF_G3, _F3), col(_OFF_BE3, _F3))
    out_ref[...] = linear_relu(w4_ref, h, col(_OFF_B4, latent))  # (latent, B)


def _pack_vectors(params):
    """Concatenate b1,g1,be1,b2,g2,be2,b3,g3,be3,b4 into one (P, 1) column."""
    cols = []
    for i in range(1, 4):
        for name in ("b", "g", "be"):
            cols.append(params[f"{name}{i}"].reshape(-1, 1))
    cols.append(params["b4"].reshape(-1, 1))
    return jnp.concatenate(cols, axis=0).astype(jnp.float32)


def _vmem_limit_bytes(batch, latent):
    """Conservative VMEM budget (padded tiles, double-buffering, headroom)."""
    f32 = 4
    lanes = ((batch + 127) // 128) * 128
    lat8 = ((max(latent, 1) + 7) // 8) * 8
    acts = (16 + 32 + 64 + 8 + lat8) * lanes * f32          # x + h1..h3 + out
    param_tiles = (32 * 128 + 64 * 128 + 8 * 128 + lat8 * 128
                   + (_OFF_B4 + lat8) * 128) * f32           # padded w1..w4 + packed col
    est = 3 * (acts + param_tiles) + (1 << 20)
    return int(min(32 * 1024 * 1024, max(4 * 1024 * 1024, est)))


def encoder_forward(x, params, latent_size):
    """x: (B, 12) float32 -> (B, latent_size) float32."""
    batch = x.shape[0]
    x_t = x.T                                # (12, B): batch on the lane axis
    pv = _pack_vectors(params)               # (312 + latent, 1)

    vmem_spec = pl.BlockSpec(memory_space=pltpu.MemorySpace.VMEM)
    out_t = pl.pallas_call(
        _encoder_kernel,
        out_shape=jax.ShapeDtypeStruct((latent_size, batch), jnp.float32),
        in_specs=[vmem_spec] * 6,
        out_specs=vmem_spec,
        compiler_params=pltpu.CompilerParams(
            vmem_limit_bytes=_vmem_limit_bytes(batch, latent_size)),
    )(x_t, params["w1"], params["w2"], params["w3"], params["w4"], pv)
    return out_t.T                           # present PyTorch's (B, latent)


def init_params(key, latent_size):
    """Deterministic synthetic parameters, PyTorch shapes: W (out,in), b (out,)."""
    dims = [(12, 32), (32, 64), (64, 8), (8, latent_size)]
    params = {}
    keys = jax.random.split(key, 2 * len(dims))
    for i, (fin, fout) in enumerate(dims, start=1):
        kw, kb = keys[2 * (i - 1)], keys[2 * (i - 1) + 1]
        bound = float(fin) ** -0.5
        params[f"w{i}"] = jax.random.uniform(
            kw, (fout, fin), jnp.float32, -bound, bound)
        params[f"b{i}"] = jax.random.uniform(
            kb, (fout,), jnp.float32, -bound, bound)
        if i <= 3:  # BatchNorm affine params (PyTorch init: gamma=1, beta=0)
            params[f"g{i}"] = jnp.ones((fout,), jnp.float32)
            params[f"be{i}"] = jnp.zeros((fout,), jnp.float32)
    return params


def _reference_forward(x, params):
    """Pure-JAX reference (PyTorch semantics) for the correctness check."""
    h = x
    for i in range(1, 5):
        h = jnp.maximum(h @ params[f"w{i}"].T + params[f"b{i}"], 0.0)
        if i <= 3:
            mean = jnp.mean(h, axis=0, keepdims=True)
            var = jnp.mean((h - mean) ** 2, axis=0, keepdims=True)
            h = (h - mean) / jnp.sqrt(var + _EPS) * params[f"g{i}"] + params[f"be{i}"]
    return h


if __name__ == "__main__":
    latent_size = 4
    batch = 128   # batch rides the 128-wide lane axis -> lane-dense layout

    key = jax.random.PRNGKey(0)
    k_params, k_x = jax.random.split(key)
    params = init_params(k_params, latent_size)
    x = jax.random.normal(k_x, (batch, 12), jnp.float32)

    out = jax.block_until_ready(encoder_forward(x, params, latent_size))
    ref = _reference_forward(x, params)

    assert out.shape == (batch, latent_size)
    assert jnp.allclose(out, ref, atol=1e-4, rtol=1e-4), float(
        jnp.max(jnp.abs(out - ref)))

    print("KERNEL_OK")
</pallas_src>

<mosaic_0001>
module attributes {stable_mosaic.version = 11 : i64} {
  func.func @_encoder_kernel(%arg0: memref<12x128xf32, #tpu.memory_space<vmem>>, %arg1: memref<32x12xf32, #tpu.memory_space<vmem>>, %arg2: memref<64x32xf32, #tpu.memory_space<vmem>>, %arg3: memref<8x64xf32, #tpu.memory_space<vmem>>, %arg4: memref<4x8xf32, #tpu.memory_space<vmem>>, %arg5: memref<316x1xf32, #tpu.memory_space<vmem>>, %arg6: memref<4x128xf32, #tpu.memory_space<vmem>>) attributes {dimension_semantics = [], scalar_prefetch = 0 : i64, scratch_operands = 0 : i64, tpu.core_type = #tpu.core_type<tc>} {
    %c0 = arith.constant 0 : index
    %c0_0 = arith.constant 0 : index
    %0 = vector.load %arg5[%c0, %c0_0] : memref<316x1xf32, #tpu.memory_space<vmem>>, vector<316x1xf32>
    %c0_1 = arith.constant 0 : index
    %c0_2 = arith.constant 0 : index
    %1 = vector.load %arg0[%c0_1, %c0_2] : memref<12x128xf32, #tpu.memory_space<vmem>>, vector<12x128xf32>
    %2 = vector.extract_strided_slice %0 {offsets = [0, 0], sizes = [32, 1], strides = [1, 1]} : vector<316x1xf32> to vector<32x1xf32>
    %c0_3 = arith.constant 0 : index
    %c0_4 = arith.constant 0 : index
    %3 = vector.load %arg1[%c0_3, %c0_4] : memref<32x12xf32, #tpu.memory_space<vmem>>, vector<32x12xf32>
    %cst = arith.constant dense<0.000000e+00> : vector<32x128xf32>
    %4 = tpu.matmul %3, %1, %cst {dimension_numbers = #tpu.dot_dimension_numbers<[1], [0], [0], [1], [0, 0, 1, 1], [], []>} : vector<32x12xf32>, vector<12x128xf32>, vector<32x128xf32> -> vector<32x128xf32>
    %5 = vector.broadcast %2 : vector<32x1xf32> to vector<32x128xf32>
    %6 = arith.addf %4, %5 : vector<32x128xf32>
    %cst_5 = arith.constant 0.000000e+00 : f32
    %7 = vector.broadcast %cst_5 : f32 to vector<32x128xf32>
    %8 = arith.maximumf %6, %7 : vector<32x128xf32>
    %9 = vector.extract_strided_slice %0 {offsets = [32, 0], sizes = [32, 1], strides = [1, 1]} : vector<316x1xf32> to vector<32x1xf32>
    %10 = vector.extract_strided_slice %0 {offsets = [64, 0], sizes = [32, 1], strides = [1, 1]} : vector<316x1xf32> to vector<32x1xf32>
    %cst_6 = arith.constant dense<0.000000e+00> : vector<32xf32>
    %11 = vector.multi_reduction <add>, %8, %cst_6 [1] : vector<32x128xf32> to vector<32xf32>
    %12 = vector.shape_cast %11 : vector<32xf32> to vector<32x1xf32>
    %13 = arith.mulf %8, %8 : vector<32x128xf32>
    %cst_7 = arith.constant dense<0.000000e+00> : vector<32xf32>
    %14 = vector.multi_reduction <add>, %13, %cst_7 [1] : vector<32x128xf32> to vector<32xf32>
    %15 = vector.shape_cast %14 : vector<32xf32> to vector<32x1xf32>
    %cst_8 = arith.constant 7.812500e-03 : f32
    %16 = vector.broadcast %cst_8 : f32 to vector<32x1xf32>
    %17 = arith.mulf %12, %16 : vector<32x1xf32>
    %cst_9 = arith.constant 7.812500e-03 : f32
    %18 = vector.broadcast %cst_9 : f32 to vector<32x1xf32>
    %19 = arith.mulf %15, %18 : vector<32x1xf32>
    %20 = arith.mulf %17, %17 : vector<32x1xf32>
    %21 = arith.subf %19, %20 : vector<32x1xf32>
    %cst_10 = arith.constant 0.000000e+00 : f32
    %22 = vector.broadcast %cst_10 : f32 to vector<32x1xf32>
    %23 = arith.maximumf %21, %22 : vector<32x1xf32>
    %cst_11 = arith.constant 9.99999974E-6 : f32
    %24 = vector.broadcast %cst_11 : f32 to vector<32x1xf32>
    %25 = arith.addf %23, %24 : vector<32x1xf32>
    %26 = math.rsqrt %25 : vector<32x1xf32>
    %27 = vector.broadcast %17 : vector<32x1xf32> to vector<32x128xf32>
    %28 = arith.subf %8, %27 : vector<32x128xf32>
    %29 = arith.mulf %26, %9 : vector<32x1xf32>
    %30 = vector.broadcast %29 : vector<32x1xf32> to vector<32x128xf32>
    %31 = arith.mulf %28, %30 : vector<32x128xf32>
    %32 = vector.broadcast %10 : vector<32x1xf32> to vector<32x128xf32>
    %33 = arith.addf %31, %32 : vector<32x128xf32>
    %34 = vector.extract_strided_slice %0 {offsets = [96, 0], sizes = [64, 1], strides = [1, 1]} : vector<316x1xf32> to vector<64x1xf32>
    %c0_12 = arith.constant 0 : index
    %c0_13 = arith.constant 0 : index
    %35 = vector.load %arg2[%c0_12, %c0_13] : memref<64x32xf32, #tpu.memory_space<vmem>>, vector<64x32xf32>
    %cst_14 = arith.constant dense<0.000000e+00> : vector<64x128xf32>
    %36 = tpu.matmul %35, %33, %cst_14 {dimension_numbers = #tpu.dot_dimension_numbers<[1], [0], [0], [1], [0, 0, 1, 1], [], []>} : vector<64x32xf32>, vector<32x128xf32>, vector<64x128xf32> -> vector<64x128xf32>
    %37 = vector.broadcast %34 : vector<64x1xf32> to vector<64x128xf32>
    %38 = arith.addf %36, %37 : vector<64x128xf32>
    %cst_15 = arith.constant 0.000000e+00 : f32
    %39 = vector.broadcast %cst_15 : f32 to vector<64x128xf32>
    %40 = arith.maximumf %38, %39 : vector<64x128xf32>
    %41 = vector.extract_strided_slice %0 {offsets = [160, 0], sizes = [64, 1], strides = [1, 1]} : vector<316x1xf32> to vector<64x1xf32>
    %42 = vector.extract_strided_slice %0 {offsets = [224, 0], sizes = [64, 1], strides = [1, 1]} : vector<316x1xf32> to vector<64x1xf32>
    %cst_16 = arith.constant dense<0.000000e+00> : vector<64xf32>
    %43 = vector.multi_reduction <add>, %40, %cst_16 [1] : vector<64x128xf32> to vector<64xf32>
    %44 = vector.shape_cast %43 : vector<64xf32> to vector<64x1xf32>
    %45 = arith.mulf %40, %40 : vector<64x128xf32>
    %cst_17 = arith.constant dense<0.000000e+00> : vector<64xf32>
    %46 = vector.multi_reduction <add>, %45, %cst_17 [1] : vector<64x128xf32> to vector<64xf32>
    %47 = vector.shape_cast %46 : vector<64xf32> to vector<64x1xf32>
    %cst_18 = arith.constant 7.812500e-03 : f32
    %48 = vector.broadcast %cst_18 : f32 to vector<64x1xf32>
    %49 = arith.mulf %44, %48 : vector<64x1xf32>
    %cst_19 = arith.constant 7.812500e-03 : f32
    %50 = vector.broadcast %cst_19 : f32 to vector<64x1xf32>
    %51 = arith.mulf %47, %50 : vector<64x1xf32>
    %52 = arith.mulf %49, %49 : vector<64x1xf32>
    %53 = arith.subf %51, %52 : vector<64x1xf32>
    %cst_20 = arith.constant 0.000000e+00 : f32
    %54 = vector.broadcast %cst_20 : f32 to vector<64x1xf32>
    %55 = arith.maximumf %53, %54 : vector<64x1xf32>
    %cst_21 = arith.constant 9.99999974E-6 : f32
    %56 = vector.broadcast %cst_21 : f32 to vector<64x1xf32>
    %57 = arith.addf %55, %56 : vector<64x1xf32>
    %58 = math.rsqrt %57 : vector<64x1xf32>
    %59 = vector.broadcast %49 : vector<64x1xf32> to vector<64x128xf32>
    %60 = arith.subf %40, %59 : vector<64x128xf32>
    %61 = arith.mulf %58, %41 : vector<64x1xf32>
    %62 = vector.broadcast %61 : vector<64x1xf32> to vector<64x128xf32>
    %63 = arith.mulf %60, %62 : vector<64x128xf32>
    %64 = vector.broadcast %42 : vector<64x1xf32> to vector<64x128xf32>
    %65 = arith.addf %63, %64 : vector<64x128xf32>
    %66 = vector.extract_strided_slice %0 {offsets = [288, 0], sizes = [8, 1], strides = [1, 1]} : vector<316x1xf32> to vector<8x1xf32>
    %c0_22 = arith.constant 0 : index
    %c0_23 = arith.constant 0 : index
    %67 = vector.load %arg3[%c0_22, %c0_23] : memref<8x64xf32, #tpu.memory_space<vmem>>, vector<8x64xf32>
    %cst_24 = arith.constant dense<0.000000e+00> : vector<8x128xf32>
    %68 = tpu.matmul %67, %65, %cst_24 {dimension_numbers = #tpu.dot_dimension_numbers<[1], [0], [0], [1], [0, 0, 1, 1], [], []>} : vector<8x64xf32>, vector<64x128xf32>, vector<8x128xf32> -> vector<8x128xf32>
    %69 = vector.broadcast %66 : vector<8x1xf32> to vector<8x128xf32>
    %70 = arith.addf %68, %69 : vector<8x128xf32>
    %cst_25 = arith.constant 0.000000e+00 : f32
    %71 = vector.broadcast %cst_25 : f32 to vector<8x128xf32>
    %72 = arith.maximumf %70, %71 : vector<8x128xf32>
    %73 = vector.extract_strided_slice %0 {offsets = [296, 0], sizes = [8, 1], strides = [1, 1]} : vector<316x1xf32> to vector<8x1xf32>
    %74 = vector.extract_strided_slice %0 {offsets = [304, 0], sizes = [8, 1], strides = [1, 1]} : vector<316x1xf32> to vector<8x1xf32>
    %cst_26 = arith.constant dense<0.000000e+00> : vector<8xf32>
    %75 = vector.multi_reduction <add>, %72, %cst_26 [1] : vector<8x128xf32> to vector<8xf32>
    %76 = vector.shape_cast %75 : vector<8xf32> to vector<8x1xf32>
    %77 = arith.mulf %72, %72 : vector<8x128xf32>
    %cst_27 = arith.constant dense<0.000000e+00> : vector<8xf32>
    %78 = vector.multi_reduction <add>, %77, %cst_27 [1] : vector<8x128xf32> to vector<8xf32>
    %79 = vector.shape_cast %78 : vector<8xf32> to vector<8x1xf32>
    %cst_28 = arith.constant 7.812500e-03 : f32
    %80 = vector.broadcast %cst_28 : f32 to vector<8x1xf32>
    %81 = arith.mulf %76, %80 : vector<8x1xf32>
    %cst_29 = arith.constant 7.812500e-03 : f32
    %82 = vector.broadcast %cst_29 : f32 to vector<8x1xf32>
    %83 = arith.mulf %79, %82 : vector<8x1xf32>
    %84 = arith.mulf %81, %81 : vector<8x1xf32>
    %85 = arith.subf %83, %84 : vector<8x1xf32>
    %cst_30 = arith.constant 0.000000e+00 : f32
    %86 = vector.broadcast %cst_30 : f32 to vector<8x1xf32>
    %87 = arith.maximumf %85, %86 : vector<8x1xf32>
    %cst_31 = arith.constant 9.99999974E-6 : f32
    %88 = vector.broadcast %cst_31 : f32 to vector<8x1xf32>
    %89 = arith.addf %87, %88 : vector<8x1xf32>
    %90 = math.rsqrt %89 : vector<8x1xf32>
    %91 = vector.broadcast %81 : vector<8x1xf32> to vector<8x128xf32>
    %92 = arith.subf %72, %91 : vector<8x128xf32>
    %93 = arith.mulf %90, %73 : vector<8x1xf32>
    %94 = vector.broadcast %93 : vector<8x1xf32> to vector<8x128xf32>
    %95 = arith.mulf %92, %94 : vector<8x128xf32>
    %96 = vector.broadcast %74 : vector<8x1xf32> to vector<8x128xf32>
    %97 = arith.addf %95, %96 : vector<8x128xf32>
    %98 = vector.extract_strided_slice %0 {offsets = [312, 0], sizes = [4, 1], strides = [1, 1]} : vector<316x1xf32> to vector<4x1xf32>
    %c0_32 = arith.constant 0 : index
    %c0_33 = arith.constant 0 : index
    %99 = vector.load %arg4[%c0_32, %c0_33] : memref<4x8xf32, #tpu.memory_space<vmem>>, vector<4x8xf32>
    %cst_34 = arith.constant dense<0.000000e+00> : vector<4x128xf32>
    %100 = tpu.matmul %99, %97, %cst_34 {dimension_numbers = #tpu.dot_dimension_numbers<[1], [0], [0], [1], [0, 0, 1, 1], [], []>} : vector<4x8xf32>, vector<8x128xf32>, vector<4x128xf32> -> vector<4x128xf32>
    %101 = vector.broadcast %98 : vector<4x1xf32> to vector<4x128xf32>
    %102 = arith.addf %100, %101 : vector<4x128xf32>
    %cst_35 = arith.constant 0.000000e+00 : f32
    %103 = vector.broadcast %cst_35 : f32 to vector<4x128xf32>
    %104 = arith.maximumf %102, %103 : vector<4x128xf32>
    %c0_36 = arith.constant 0 : index
    %c0_37 = arith.constant 0 : index
    %105 = vector.load %arg6[%c0_36, %c0_37] : memref<4x128xf32, #tpu.memory_space<vmem>>, vector<4x128xf32>
    tpu.vector_store %arg6[%c0_36, %c0_37], %104 {strides = array<i32>} : memref<4x128xf32, #tpu.memory_space<vmem>>, vector<4x128xf32>,
    return
  }
}

</mosaic_0001>

<bundles_post_ra>
// kernel: tpu_custom_call.1
= control target key start
LH: loop header
LB: loop body
LE: loop exit
PB: predicated region body
PF: predicated region fallthrough
CT: control target
= control target key end

     0   :  { %vm103_vm0 = vcmask 1043456   ;;  %vm90_vm1 = vcmask 97280   ;;  %v876_v5 = vmov 0   ;;  %s1257_s0 = inlined_call_operand.vmem [shape: f32[12,128], index: 0, kind: input, shape index: {}]   ;;  %s1258_s1 = inlined_call_operand.vmem [shape: f32[32,12], index: 1, kind: input, shape index: {}]   ;;  %s1259_s2 = inlined_call_operand.vmem [shape: f32[64,32], index: 2, kind: input, shape index: {}]   ;;  %s1260_s3 = inlined_call_operand.vmem [shape: f32[8,64], index: 3, kind: input, shape index: {}]   ;;  %s1261_s4 = inlined_call_operand.vmem [shape: f32[4,8], index: 4, kind: input, shape index: {}]   ;;  %s1262_s5 = inlined_call_operand.vmem [shape: f32[316,1], index: 5, kind: input, shape index: {}]   ;;  %s1263_s6 = inlined_call_operand.hbm [shape: f32[4,128], index: 6, kind: output, shape index: {}]  }
   0x1   :  { %v65_v0 = vld [vmem:[%s1257_s0 + $0x8] sm:$0xf]  ;;  %v64_v1 = vld [vmem:[%s1257_s0] sm:$0xff]  ;;  %v27_v4 = vld [vmem:[%s1262_s5 + $0x18] sm:$0xff]  ;;  %822 = vset.pattern.permute.xlu1 %v876_v5  ;;  %821 = vset.pattern.permute.xlu0 %v876_v5 }
   0x2   :  { %796 = vmatpush.msk.msra.mxu0 %vm103_vm0, %v65_v0  ;;  %v66_v2 = vld [vmem:[%s1258_s1] sm:$0xff]  ;;  %v25_v3 = vld [vmem:[%s1262_s5 + $0x8] sm:$0xff] }
   0x3   :  { %77 = vperm.xlu1 %822, %v25_v3  }
   0x4   :  { %122 = vmatpush.msra.mxu0 %v64_v1 }
   0x5   :  { %11 = vsyncpa [#allocation3], 0  ;;  %797 = vmatmul.msk.f32.vlgmr.msra.gmra.mxu0 %vm90_vm1, %v66_v2  ;;  %87 = vperm.xlu0 %821, %v27_v4   ;;  %v24_v6 = vld [vmem:[%s1262_s5] sm:$0xff]  ;;  %v67_v7 = vld [vmem:[%s1258_s1 + $0x8] sm:$0xff]  ;;  %vm328_vm14 = vcmask 261120   ;;  %s877_s26 = smov [#allocation2]  }
   0x6   :  { %823 = vset.pattern.permute.xlu2 %v876_v5  ;;  %v26_v8 = vld [vmem:[%s1262_s5 + $0x10] sm:$0xff]  ;;  %v69_v10 = vld [vmem:[%s1258_s1 + $0x18] sm:$0xff]  ;;  %v33_v30 = vld [vmem:[%s1262_s5 + $0x48] sm:$0xff]  ;;  %s785_s27 = sshll.u32 %s877_s26, 4  ;;  %s786_s27 = int_to_ptr.vmem [resolvable:$true] %s785_s27 }
   0x7   :  { %v68_v9 = vld [vmem:[%s1258_s1 + $0x10] sm:$0xff]  ;;  %v35_v26 = vld [vmem:[%s1262_s5 + $0x58] sm:$0xff]  ;;  %v36_v36 = vld [vmem:[%s1262_s5 + $0x60] sm:$0xff] }
   0x8   :  { %v34_v31 = vld [vmem:[%s1262_s5 + $0x50] sm:$0xff]  ;;  %v39_v35 = vld [vmem:[%s1262_s5 + $0x78] sm:$0xff] }
   0x9   :  { %v42_v33 = vld [vmem:[%s1262_s5 + $0x90] sm:$0xff] }
   0xa   :  { %v30_v5 = vld [vmem:[%s1262_s5 + $0x30] sm:$0xff] }
   0xb   :  { %72 = vperm.xlu1 %822, %v24_v6  }
   0xd   :  { %798 = vmatmul.msk.f32.gmra.mxu0 %vm90_vm1, %v67_v7  ;;  %82 = vperm.xlu0 %821, %v26_v8  }
  0x15   :  { %799 = vmatmul.msk.f32.gmra.mxu0 %vm90_vm1, %v68_v9 }
  0x1d   :  { %800 = vmatmul.msk.f32.gmra.mxu0 %vm90_vm1, %v69_v10 }
  0x75   :  { %v78_v13 = vpop.permute.xlu1 %77 }
  0x77   :  { %v88_v12 = vpop.permute.xlu0 %87 }
  0x7d   :  { %v73_v27 = vpop.permute.xlu1 %72 }
  0x7f   :  { %v83_v17 = vpop.permute.xlu0 %82 }
  0x82   :  { %v124_v11 = vpop.f32.mrf.mxu0 }
  0x83   :  { %v125_v28 = vadd.f32 %v124_v11, %v73_v27 }
  0x85   :  { %v963_v29 = vmax.f32 %v125_v28, 0.0 }
  0x87   :  { %v148_v34 = vmul.f32 %v963_v29, %v963_v29 }
  0x8a   :  { %v127_v14 = vpop.f32.mrf.mxu0 }
  0x8b   :  { %v128_v15 = vadd.f32 %v127_v14, %v78_v13 }
  0x8d   :  { %v947_v16 = vmax.f32 %v128_v15, 0.0 }
  0x8f   :  { %142 = vadd.xlane.f32.xlu1 %v947_v16  ;;  %v149_v32 = vmul.f32 %v947_v16, %v947_v16 }
  0x92   :  { %v130_v18 = vpop.f32.mrf.mxu0 }
  0x93   :  { %v131_v19 = vadd.f32 %v130_v18, %v83_v17 }
  0x95   :  { %v950_v20 = vmax.f32 %v131_v19, 0.0 }
  0x97   :  { %144 = vadd.xlane.f32.xlu2 %v950_v20  ;;  %v150_v25 = vmul.f32 %v950_v20, %v950_v20 }
  0x9a   :  { %v133_v21 = vpop.f32.mrf.mxu0 }
  0x9b   :  { %v134_v22 = vadd.f32 %v133_v21, %v88_v12 }
  0x9d   :  { %v953_v23 = vmax.f32 %v134_v22, 0.0  ;;  %v32_v22 = vld [vmem:[%s1262_s5 + $0x40] sm:$0xff] }
  0x9f   :  { %146 = vadd.xlane.f32.xlu2 %v953_v23  ;;  %v151_v24 = vmul.f32 %v953_v23, %v953_v23 }
  0xa1   :  { %158 = vadd.xlane.f32.xlu0 %v151_v24 }
  0xa7   :  { %156 = vadd.xlane.f32.xlu2 %v150_v25 }
  0xa8   :  { %273 = vperm.xlu1 %822, %v35_v26  }
  0xaf   :  { %140 = vadd.xlane.f32.xlu2 %v963_v29 }
  0xb0   :  { %263 = vperm.xlu1 %822, %v33_v30  }
  0xb5   :  { %268 = vperm.xlu0 %821, %v34_v31   ;;  %v29_v31 = vld [vmem:[%s1262_s5 + $0x28] sm:$0xff] }
  0xb7   :  { %154 = vadd.xlane.f32.xlu2 %v149_v32 }
  0xb8   :  { %320 = vperm.xlu1 %822, %v42_v33  }
  0xbf   :  { %152 = vadd.xlane.f32.xlu2 %v148_v34  ;;  %v41_v34 = vld [vmem:[%s1262_s5 + $0x88] sm:$0xff] }
  0xc0   :  { %305 = vperm.xlu1 %822, %v39_v35  }
  0xc8   :  { %290 = vperm.xlu1 %822, %v36_v36  }
 0x102   :  { %v143_v52 = vpop.xlane.xlu1 %142 }
 0x103   :  { %v993_v54 = vmul.f32 0.0078125, %v143_v52  ;;  %v37_v52 = vld [vmem:[%s1262_s5 + $0x68] sm:$0xff] }
 0x105   :  { %v169_v59 = vmul.f32 %v993_v54, %v993_v54 }
 0x10a   :  { %v145_v37 = vpop.xlane.xlu2 %144 }
 0x10b   :  { %v985_v39 = vmul.f32 0.0078125, %v145_v37 }
 0x10d   :  { %v170_v43 = vmul.f32 %v985_v39, %v985_v39 }
 0x112   :  { %v147_v38 = vpop.xlane.xlu2 %146 }
 0x113   :  { %v987_v40 = vmul.f32 0.0078125, %v147_v38 }
 0x114   :  { %v159_v41 = vpop.xlane.xlu0 %158 }
 0x115   :  { %v171_v45 = vmul.f32 %v987_v40, %v987_v40  ;;  %v167_v46 = vmul.f32 0.0078125, %v159_v41 }
 0x117   :  { %v175_v49 = vsub.f32 %v167_v46, %v171_v45 }
 0x119   :  { %v179_v53 = vmax.f32 %v175_v49, 0.0 }
 0x11a   :  { %v157_v42 = vpop.xlane.xlu2 %156 }
 0x11b   :  { %v166_v44 = vmul.f32 0.0078125, %v157_v42  ;;  %v183_v56 = vadd.f32 1e-05, %v179_v53  ;;  %v31_v42 = vld [vmem:[%s1262_s5 + $0x38] sm:$0xff] }
 0x11d   :  { %v174_v47 = vsub.f32 %v166_v44, %v170_v43  ;;  %vm220_vm9 = vweird.f32 %v183_v56  ;;  %v38_v44 = vld [vmem:[%s1262_s5 + $0x70] sm:$0xff] }
 0x11f   :  { %v178_v48 = vmax.f32 %v174_v47, 0.0  ;;  %v28_v47 = vld [vmem:[%s1262_s5 + $0x20] sm:$0xff] }
 0x121   :  { %v182_v50 = vadd.f32 1e-05, %v178_v48 }
 0x122   :  { %v141_v51 = vpop.xlane.xlu2 %140 }
 0x123   :  { %824 = vrsqrt.f32 %v182_v50  ;;  %v997_v0 = vmul.f32 0.0078125, %v141_v51  ;;  %vm210_vm3 = vweird.f32 %v182_v50  ;;  %v40_v51 = vld [vmem:[%s1262_s5 + $0x80] sm:$0xff] }
 0x124   :  { %826 = vrsqrt.f32 %v183_v56 }
 0x125   :  { %v168_v8 = vmul.f32 %v997_v0, %v997_v0 }
 0x127   :  { %v269_v53 = vpop.permute.xlu0 %268 }
 0x129   :  { %v825_v55 = vpop.eup %824 }
 0x12a   :  { %v205_v57 = vmul.f32 %v825_v55, %v182_v50  ;;  %v155_v58 = vpop.xlane.xlu2 %154  ;;  %vm211_vm2 = vweird.f32 %v825_v55  ;;  %v827_v7 = vpop.eup %826  ;;  %v43_v50 = vld [vmem:[%s1262_s5 + $0x98] sm:$0xff] }
 0x12b   :  { %v165_v60 = vmul.f32 0.0078125, %v155_v58  ;;  %vm212_vm4 = vmor %vm210_vm3, %vm211_vm2  ;;  %v215_v13 = vmul.f32 %v827_v7, %v183_v56  ;;  %vm221_vm8 = vweird.f32 %v827_v7  ;;  %v274_v56 = vpop.permute.xlu1 %273  ;;  %v227_v58 = vsub.f32 %v953_v23, %v987_v40 }
 0x12c   :  { %v206_v61 = vmul.f32 %v825_v55, %v205_v57  ;;  %vm222_vm10 = vmor %vm220_vm9, %vm221_vm8  ;;  %v226_v57 = vsub.f32 %v950_v20, %v985_v39  ;;  %v224_v20 = vsub.f32 %v963_v29, %v997_v0  ;;  %v287_v29 = vld [vmem:[%s1259_s2 + $0x38] sm:$0xff]  ;;  %v281_v0 = vld [vmem:[%s1259_s2 + $0x8] sm:$0xff] }
 0x12d   :  { %v173_v62 = vsub.f32 %v165_v60, %v169_v59  ;;  %v216_v18 = vmul.f32 %v827_v7, %v215_v13 }
 0x12e   :  { %v207_v63 = vmul.f32 0.5, %v206_v61  ;;  %v225_v61 = vsub.f32 %v947_v16, %v993_v54  ;;  %v280_v54 = vld [vmem:[%s1259_s2] sm:$0xff] }
 0x12f   :  { %v177_v1 = vmax.f32 %v173_v62, 0.0  ;;  %v217_v24 = vmul.f32 0.5, %v216_v18 }
 0x130   :  { %v208_v2 = vsub.f32 1.5, %v207_v63 }
 0x131   :  { %v181_v3 = vadd.f32 1e-05, %v177_v1  ;;  %v218_v28 = vsub.f32 1.5, %v217_v24 }
 0x132   :  { %v153_v4 = vpop.xlane.xlu2 %152  ;;  %v209_v6 = vmul.f32 %v825_v55, %v208_v2 }
 0x133   :  { %828 = vrsqrt.f32 %v181_v3  ;;  %v164_v9 = vmul.f32 0.0078125, %v153_v4  ;;  %vm200_vm6 = vweird.f32 %v181_v3  ;;  %v219_v38 = vmul.f32 %v827_v7, %v218_v28  ;;  %v264_v4 = vpop.permute.xlu1 %263 }
 0x134   :  { %v213_v10 = vsel %vm212_vm4, %v825_v55, %v209_v6  ;;  %v284_v6 = vld [vmem:[%s1259_s2 + $0x20] sm:$0xff] }
 0x135   :  { %v172_v11 = vsub.f32 %v164_v9, %v168_v8  ;;  %v230_v12 = vmul.f32 %v213_v10, %v30_v5  ;;  %v223_v43 = vsel %vm222_vm10, %v827_v7, %v219_v38  ;;  %v285_v7 = vld [vmem:[%s1259_s2 + $0x28] sm:$0xff]  ;;  %v282_v8 = vld [vmem:[%s1259_s2 + $0x10] sm:$0xff]  ;;  %v283_v10 = vld [vmem:[%s1259_s2 + $0x18] sm:$0xff] }
 0x136   :  { %v231_v45 = vmul.f32 %v223_v43, %v31_v42  ;;  %v286_v9 = vld [vmem:[%s1259_s2 + $0x30] sm:$0xff] }
 0x137   :  { %v176_v14 = vmax.f32 %v172_v11, 0.0  ;;  %244 = vperm.xlu0 %821, %v230_v12  }
 0x139   :  { %v829_v15 = vpop.eup %828  ;;  %v180_v17 = vadd.f32 1e-05, %v176_v14 }
 0x13a   :  { %v195_v19 = vmul.f32 %v829_v15, %v181_v3  ;;  %vm201_vm5 = vweird.f32 %v829_v15 }
 0x13b   :  { %830 = vrsqrt.f32 %v180_v17  ;;  %vm202_vm7 = vmor %vm200_vm6, %vm201_vm5  ;;  %vm190_vm12 = vweird.f32 %v180_v17  ;;  %v321_v11 = vpop.permute.xlu1 %320 }
 0x13c   :  { %v196_v21 = vmul.f32 %v829_v15, %v195_v19 }
 0x13e   :  { %v197_v25 = vmul.f32 0.5, %v196_v21 }
 0x13f   :  { %258 = vperm.xlu0 %821, %v32_v22  }
 0x140   :  { %v198_v26 = vsub.f32 1.5, %v197_v25 }
 0x141   :  { %v831_v27 = vpop.eup %830 }
 0x142   :  { %v185_v30 = vmul.f32 %v831_v27, %v180_v17  ;;  %v199_v32 = vmul.f32 %v829_v15, %v198_v26  ;;  %vm191_vm11 = vweird.f32 %v831_v27 }
 0x143   :  { %vm192_vm13 = vmor %vm190_vm12, %vm191_vm11  ;;  %v306_v12 = vpop.permute.xlu1 %305 }
 0x144   :  { %v186_v33 = vmul.f32 %v831_v27, %v185_v30  ;;  %v203_v35 = vsel %vm202_vm7, %v829_v15, %v199_v32 }
 0x145   :  { %v229_v36 = vmul.f32 %v203_v35, %v29_v31 }
 0x146   :  { %v187_v37 = vmul.f32 0.5, %v186_v33 }
 0x147   :  { %315 = vperm.xlu0 %821, %v41_v34   ;;  %239 = vperm.xlu2 %823, %v229_v36  }
 0x148   :  { %v188_v41 = vsub.f32 1.5, %v187_v37 }
 0x14a   :  { %v189_v46 = vmul.f32 %v831_v27, %v188_v41 }
 0x14b   :  { %v291_v14 = vpop.permute.xlu1 %290 }
 0x14c   :  { %v193_v48 = vsel %vm192_vm13, %v831_v27, %v189_v46 }
 0x14d   :  { %v228_v49 = vmul.f32 %v193_v48, %v28_v47 }
 0x14f   :  { %300 = vperm.xlu0 %821, %v38_v44   ;;  %249 = vperm.xlu2 %823, %v231_v45  }
 0x157   :  { %234 = vperm.xlu2 %823, %v228_v49  }
 0x15f   :  { %325 = vperm.xlu2 %823, %v43_v50  }
 0x167   :  { %310 = vperm.xlu2 %823, %v40_v51  }
 0x16f   :  { %295 = vperm.xlu2 %823, %v37_v52  }
 0x1a1   :  { %v240_v55 = vpop.permute.xlu2 %239 }
 0x1a2   :  { %v253_v1 = vmul.f32 %v240_v55, %v225_v61  ;;  %v57_v61 = vld [vmem:[%s1262_s5 + $0x108] sm:$0xff] }
 0x1a4   :  { %v277_v5 = vadd.f32 %v264_v4, %v253_v1 }
 0x1a9   :  { %v245_v59 = vpop.permute.xlu0 %244  ;;  %v250_v60 = vpop.permute.xlu2 %249 }
 0x1aa   :  { %v254_v62 = vmul.f32 %v245_v59, %v226_v57  ;;  %v255_v63 = vmul.f32 %v250_v60, %v227_v58  ;;  %v59_v58 = vld [vmem:[%s1262_s5 + $0x118] sm:$0xff]  ;;  %v56_v59 = vld [vmem:[%s1262_s5 + $0x100] sm:$0xff]  ;;  %v58_v60 = vld [vmem:[%s1262_s5 + $0x110] sm:$0xff] }
 0x1ac   :  { %v279_v2 = vadd.f32 %v274_v56, %v255_v63  ;;  %v278_v3 = vadd.f32 %v269_v53, %v254_v62  ;;  %v55_v62 = vld [vmem:[%s1262_s5 + $0xf8] sm:$0xff] }
 0x1ae   :  { %365 = vmatpush.msra.mxu1 %v279_v2  ;;  %811 = vmatpush.msra.mxu2 %v279_v2 }
 0x1af   :  { %812 = vmatpush.msra.mxu3 %v279_v2 }
 0x1b0   :  { %366 = vmatpush.msra.mxu1 %v278_v3  ;;  %813 = vmatpush.msra.mxu2 %v278_v3 }
 0x1b1   :  { %814 = vmatpush.msra.mxu3 %v278_v3  ;;  %v235_v23 = vpop.permute.xlu2 %234  ;;  %v259_v16 = vpop.permute.xlu0 %258 }
 0x1b2   :  { %v252_v39 = vmul.f32 %v235_v23, %v224_v20  ;;  %367 = vmatpush.msra.mxu1 %v277_v5  ;;  %815 = vmatpush.msra.mxu2 %v277_v5 }
 0x1b3   :  { %816 = vmatpush.msra.mxu3 %v277_v5 }
 0x1b4   :  { %v276_v40 = vadd.f32 %v259_v16, %v252_v39 }
 0x1b6   :  { %368 = vmatpush.msra.mxu1 %v276_v40  ;;  %817 = vmatpush.msra.mxu2 %v276_v40 }
 0x1b7   :  { %818 = vmatpush.msra.mxu3 %v276_v40  ;;  %801 = vmatmul.msk.f32.vlgmr.msra.gmra.mxu1 %vm328_vm14, %v280_v54 }
 0x1b8   :  { %805 = vmatmul.msk.f32.vlgmr.msra.gmra.mxu2 %vm328_vm14, %v284_v6  ;;  %808 = vmatmul.msk.f32.vlgmr.msra.gmra.mxu3 %vm328_vm14, %v287_v29 }
 0x1b9   :  { %v326_v13 = vpop.permute.xlu2 %325  ;;  %v316_v32 = vpop.permute.xlu0 %315 }
 0x1bf   :  { %802 = vmatmul.msk.f32.gmra.mxu1 %vm328_vm14, %v281_v0 }
 0x1c0   :  { %806 = vmatmul.msk.f32.gmra.mxu2 %vm328_vm14, %v285_v7 }
 0x1c1   :  { %v311_v21 = vpop.permute.xlu2 %310  ;;  %v301_v46 = vpop.permute.xlu0 %300 }
 0x1c7   :  { %803 = vmatmul.msk.f32.gmra.mxu1 %vm328_vm14, %v282_v8 }
 0x1c8   :  { %807 = vmatmul.msk.f32.gmra.mxu2 %vm328_vm14, %v286_v9 }
 0x1c9   :  { %v296_v43 = vpop.permute.xlu2 %295 }
 0x1cf   :  { %804 = vmatmul.msk.f32.gmra.mxu1 %vm328_vm14, %v283_v10 }
 0x234   :  { %v370_v15 = vpop.f32.mrf.mxu1 }
 0x235   :  { %v371_v17 = vadd.f32 %v370_v15, %v291_v14 }
 0x237   :  { %v1071_v18 = vmax.f32 %v371_v17, 0.0 }
 0x239   :  { %402 = vadd.xlane.f32.xlu2 %v1071_v18  ;;  %v418_v19 = vmul.f32 %v1071_v18, %v1071_v18 }
 0x23b   :  { %v382_v22 = vpop.f32.mrf.mxu2  ;;  %v391_v24 = vpop.f32.mrf.mxu3  ;;  %426 = vadd.xlane.f32.xlu0 %v418_v19 }
 0x23c   :  { %v383_v25 = vadd.f32 %v382_v22, %v311_v21  ;;  %v392_v26 = vadd.f32 %v391_v24, %v326_v13  ;;  %v373_v30 = vpop.f32.mrf.mxu1 }
 0x23d   :  { %v374_v45 = vadd.f32 %v373_v30, %v296_v43 }
 0x23e   :  { %v1076_v27 = vmax.f32 %v383_v25, 0.0  ;;  %v1079_v28 = vmax.f32 %v392_v26, 0.0 }
 0x23f   :  { %v1094_v48 = vmax.f32 %v374_v45, 0.0 }
 0x240   :  { %410 = vadd.xlane.f32.xlu1 %v1076_v27  ;;  %v425_v34 = vmul.f32 %v1079_v28, %v1079_v28  ;;  %v422_v42 = vmul.f32 %v1076_v27, %v1076_v27 }
 0x241   :  { %v419_v55 = vmul.f32 %v1094_v48, %v1094_v48 }
 0x243   :  { %v385_v31 = vpop.f32.mrf.mxu2  ;;  %416 = vadd.xlane.f32.xlu0 %v1079_v28 }
 0x244   :  { %v386_v33 = vadd.f32 %v385_v31, %v316_v32  ;;  %v376_v38 = vpop.f32.mrf.mxu1 }
 0x245   :  { %v377_v47 = vadd.f32 %v376_v38, %v301_v46 }
 0x246   :  { %v1084_v35 = vmax.f32 %v386_v33, 0.0 }
 0x247   :  { %v1099_v51 = vmax.f32 %v377_v47, 0.0 }
 0x248   :  { %440 = vadd.xlane.f32.xlu1 %v425_v34  ;;  %v423_v44 = vmul.f32 %v1084_v35, %v1084_v35 }
 0x249   :  { %v420_v56 = vmul.f32 %v1099_v51, %v1099_v51 }
 0x24b   :  { %v388_v36 = vpop.f32.mrf.mxu2  ;;  %412 = vadd.xlane.f32.xlu0 %v1084_v35 }
 0x24c   :  { %v389_v37 = vadd.f32 %v388_v36, %v321_v11  ;;  %v379_v50 = vpop.f32.mrf.mxu1 }
 0x24d   :  { %v380_v52 = vadd.f32 %v379_v50, %v306_v12 }
 0x24e   :  { %v1087_v41 = vmax.f32 %v389_v37, 0.0 }
 0x24f   :  { %v1102_v53 = vmax.f32 %v380_v52, 0.0 }
 0x250   :  { %434 = vadd.xlane.f32.xlu1 %v422_v42  ;;  %414 = vadd.xlane.f32.xlu2 %v1087_v41  ;;  %v424_v49 = vmul.f32 %v1087_v41, %v1087_v41 }
 0x251   :  { %v421_v57 = vmul.f32 %v1102_v53, %v1102_v53 }
 0x253   :  { %436 = vadd.xlane.f32.xlu0 %v423_v44 }
 0x258   :  { %404 = vadd.xlane.f32.xlu1 %v1094_v48  ;;  %438 = vadd.xlane.f32.xlu2 %v424_v49 }
 0x25b   :  { %406 = vadd.xlane.f32.xlu0 %v1099_v51 }
 0x260   :  { %428 = vadd.xlane.f32.xlu1 %v419_v55  ;;  %408 = vadd.xlane.f32.xlu2 %v1102_v53 }
 0x263   :  { %430 = vadd.xlane.f32.xlu0 %v420_v56 }
 0x268   :  { %432 = vadd.xlane.f32.xlu2 %v421_v57 }
 0x277   :  { %671 = vperm.xlu0 %821, %v59_v58   ;;  %v51_v58 = vld [vmem:[%s1262_s5 + $0xd8] sm:$0xff] }
 0x279   :  { %656 = vperm.xlu1 %822, %v56_v59  }
 0x27f   :  { %666 = vperm.xlu0 %821, %v58_v60  }
 0x280   :  { %661 = vperm.xlu2 %823, %v57_v61  }
 0x287   :  { %651 = vperm.xlu0 %821, %v55_v62  }
 0x2ac   :  { %v403_v4 = vpop.xlane.xlu2 %402 }
 0x2ad   :  { %v1134_v8 = vmul.f32 0.0078125, %v403_v4 }
 0x2ae   :  { %v427_v63 = vpop.xlane.xlu0 %426 }
 0x2af   :  { %v458_v17 = vmul.f32 %v1134_v8, %v1134_v8  ;;  %v450_v19 = vmul.f32 0.0078125, %v427_v63 }
 0x2b1   :  { %v466_v36 = vsub.f32 %v450_v19, %v458_v17 }
 0x2b3   :  { %v411_v1 = vpop.xlane.xlu1 %410  ;;  %v474_v46 = vmax.f32 %v466_v36, 0.0 }
 0x2b4   :  { %v1130_v54 = vmul.f32 0.0078125, %v411_v1 }
 0x2b5   :  { %v1163_v62 = vadd.f32 1e-05, %v474_v46 }
 0x2b6   :  { %v417_v2 = vpop.xlane.xlu0 %416  ;;  %v462_v9 = vmul.f32 %v1130_v54, %v1130_v54 }
 0x2b7   :  { %v1126_v3 = vmul.f32 0.0078125, %v417_v2 }
 0x2b9   :  { %v465_v20 = vmul.f32 %v1126_v3, %v1126_v3 }
 0x2bb   :  { %v441_v5 = vpop.xlane.xlu1 %440 }
 0x2bc   :  { %v457_v23 = vmul.f32 0.0078125, %v441_v5 }
 0x2be   :  { %v473_v39 = vsub.f32 %v457_v23, %v465_v20  ;;  %v413_v16 = vpop.xlane.xlu0 %412 }
 0x2bf   :  { %v1132_v29 = vmul.f32 0.0078125, %v413_v16 }
 0x2c0   :  { %v481_v40 = vmax.f32 %v473_v39, 0.0 }
 0x2c1   :  { %v463_v12 = vmul.f32 %v1132_v29, %v1132_v29 }
 0x2c2   :  { %v489_v6 = vadd.f32 1e-05, %v481_v40 }
 0x2c3   :  { %v415_v0 = vpop.xlane.xlu2 %414  ;;  %v435_v7 = vpop.xlane.xlu1 %434 }
 0x2c4   :  { %832 = vrsqrt.f32 %v489_v6  ;;  %v454_v10 = vmul.f32 0.0078125, %v435_v7  ;;  %v1140_v15 = vmul.f32 0.0078125, %v415_v0  ;;  %vm566_vm0 = vweird.f32 %v489_v6 }
 0x2c6   :  { %v437_v11 = vpop.xlane.xlu0 %436  ;;  %v470_v13 = vsub.f32 %v454_v10, %v462_v9  ;;  %v464_v33 = vmul.f32 %v1140_v15, %v1140_v15 }
 0x2c7   :  { %v455_v14 = vmul.f32 0.0078125, %v437_v11 }
 0x2c8   :  { %v478_v21 = vmax.f32 %v470_v13, 0.0 }
 0x2c9   :  { %v471_v22 = vsub.f32 %v455_v14, %v463_v12 }
 0x2ca   :  { %v833_v24 = vpop.eup %832  ;;  %v1144_v26 = vadd.f32 1e-05, %v478_v21 }
 0x2cb   :  { %v561_v25 = vmul.f32 %v833_v24, %v489_v6  ;;  %v479_v30 = vmax.f32 %v471_v22, 0.0  ;;  %v439_v31 = vpop.xlane.xlu2 %438  ;;  %v405_v32 = vpop.xlane.xlu1 %404  ;;  %vm567_vm15 = vweird.f32 %v833_v24 }
 0x2cc   :  { %v456_v34 = vmul.f32 0.0078125, %v439_v31  ;;  %834 = vrsqrt.f32 %v1144_v26  ;;  %v1152_v49 = vmul.f32 0.0078125, %v405_v32  ;;  %vm568_vm1 = vmor %vm566_vm0, %vm567_vm15  ;;  %vm536_vm2 = vweird.f32 %v1144_v26 }
 0x2cd   :  { %v562_v37 = vmul.f32 %v833_v24, %v561_v25  ;;  %v1149_v38 = vadd.f32 1e-05, %v479_v30  ;;  %v48_v30 = vld [vmem:[%s1262_s5 + $0xc0] sm:$0xff] }
 0x2ce   :  { %v472_v42 = vsub.f32 %v456_v34, %v464_v33  ;;  %v407_v43 = vpop.xlane.xlu0 %406  ;;  %v459_v63 = vmul.f32 %v1152_v49, %v1152_v49 }
 0x2cf   :  { %v563_v44 = vmul.f32 0.5, %v562_v37  ;;  %836 = vrsqrt.f32 %v1149_v38  ;;  %v1156_v55 = vmul.f32 0.0078125, %v407_v43  ;;  %vm546_vm6 = vweird.f32 %v1149_v38  ;;  %v49_v37 = vld [vmem:[%s1262_s5 + $0xc8] sm:$0xff] }
 0x2d0   :  { %v480_v45 = vmax.f32 %v472_v42, 0.0 }
 0x2d1   :  { %v564_v47 = vsub.f32 1.5, %v563_v44  ;;  %v460_v39 = vmul.f32 %v1156_v55, %v1156_v55 }
 0x2d2   :  { %v1154_v50 = vadd.f32 1e-05, %v480_v45  ;;  %v835_v52 = vpop.eup %834 }
 0x2d3   :  { %v409_v56 = vpop.xlane.xlu2 %408  ;;  %v429_v57 = vpop.xlane.xlu1 %428  ;;  %v565_v59 = vmul.f32 %v833_v24, %v564_v47  ;;  %v531_v60 = vmul.f32 %v835_v52, %v1144_v26  ;;  %vm537_vm3 = vweird.f32 %v835_v52 }
 0x2d4   :  { %838 = vrsqrt.f32 %v1154_v50  ;;  %v451_v1 = vmul.f32 0.0078125, %v429_v57  ;;  %v1170_v16 = vmul.f32 0.0078125, %v409_v56  ;;  %vm538_vm5 = vmor %vm536_vm2, %vm537_vm3  ;;  %vm556_vm9 = vweird.f32 %v1154_v50 }
 0x2d5   :  { %v837_v61 = vpop.eup %836  ;;  %v569_v2 = vsel %vm568_vm1, %v833_v24, %v565_v59  ;;  %v532_v4 = vmul.f32 %v835_v52, %v531_v60  ;;  %840 = vrsqrt.f32 %v1163_v62 }
 0x2d6   :  { %v541_v5 = vmul.f32 %v837_v61, %v1149_v38  ;;  %v431_v20 = vpop.xlane.xlu0 %430  ;;  %v585_v23 = vmul.f32 %v569_v2, %v51_v58  ;;  %v467_v40 = vsub.f32 %v451_v1, %v459_v63  ;;  %v461_v17 = vmul.f32 %v1170_v16, %v1170_v16 }
 0x2d7   :  { %v452_v6 = vmul.f32 0.0078125, %v431_v20  ;;  %v533_v0 = vmul.f32 0.5, %v532_v4  ;;  %vm547_vm4 = vweird.f32 %v837_v61 }
 0x2d8   :  { %v542_v7 = vmul.f32 %v837_v61, %v541_v5  ;;  %623 = vperm.xlu2 %823, %v585_v23   ;;  %v475_v9 = vmax.f32 %v467_v40, 0.0  ;;  %vm548_vm7 = vmor %vm546_vm6, %vm547_vm4 }
 0x2d9   :  { %v468_v10 = vsub.f32 %v452_v6, %v460_v39  ;;  %v534_v12 = vsub.f32 1.5, %v533_v0 }
 0x2da   :  { %v839_v11 = vpop.eup %838  ;;  %v543_v13 = vmul.f32 0.5, %v542_v7  ;;  %v483_v19 = vadd.f32 1e-05, %v475_v9  ;;  %v45_v7 = vld [vmem:[%s1262_s5 + $0xa8] sm:$0xff] }
 0x2db   :  { %v551_v14 = vmul.f32 %v839_v11, %v1154_v50  ;;  %v476_v21 = vmax.f32 %v468_v10, 0.0  ;;  %v433_v22 = vpop.xlane.xlu2 %432  ;;  %v535_v31 = vmul.f32 %v835_v52, %v534_v12  ;;  %v1186_v43 = vpop.eup %840  ;;  %vm557_vm8 = vweird.f32 %v839_v11  ;;  %v46_v12 = vld [vmem:[%s1262_s5 + $0xb0] sm:$0xff] }
 0x2dc   :  { %v544_v24 = vsub.f32 1.5, %v543_v13  ;;  %v453_v25 = vmul.f32 0.0078125, %v433_v22  ;;  %842 = vrsqrt.f32 %v483_v19  ;;  %vm558_vm10 = vmor %vm556_vm9, %vm557_vm8  ;;  %v491_v4 = vmul.f32 %v1186_v43, %v1163_v62 }
 0x2dd   :  { %v552_v32 = vmul.f32 %v839_v11, %v551_v14  ;;  %v484_v33 = vadd.f32 1e-05, %v476_v21  ;;  %v539_v36 = vsel %vm538_vm5, %v835_v52, %v535_v31  ;;  %v50_v52 = vld [vmem:[%s1262_s5 + $0xd0] sm:$0xff]  ;;  %vm506_vm12 = vweird.f32 %v483_v19 }
 0x2de   :  { %v469_v34 = vsub.f32 %v453_v25, %v461_v17  ;;  %v545_v42 = vmul.f32 %v837_v61, %v544_v24  ;;  %v582_v45 = vmul.f32 %v539_v36, %v48_v30  ;;  %v492_v40 = vmul.f32 %v1186_v43, %v491_v4  ;;  %v47_v30 = vld [vmem:[%s1262_s5 + $0xb8] sm:$0xff] }
 0x2df   :  { %v553_v44 = vmul.f32 0.5, %v552_v32  ;;  %844 = vrsqrt.f32 %v484_v33  ;;  %vm516_vm15 = vweird.f32 %v484_v33  ;;  %vm497_vm4 = vweird.f32 %v1186_v43 }
 0x2e0   :  { %v477_v46 = vmax.f32 %v469_v34, 0.0  ;;  %v549_v47 = vsel %vm548_vm7, %v837_v61, %v545_v42  ;;  %608 = vperm.xlu1 %822, %v582_v45   ;;  %v493_v14 = vmul.f32 0.5, %v492_v40  ;;  %v53_v34 = vld [vmem:[%s1262_s5 + $0xe8] sm:$0xff]  ;;  %vm496_vm5 = vweird.f32 %v1163_v62  ;;  %v44_v42 = vld [vmem:[%s1262_s5 + $0xa0] sm:$0xff] }
 0x2e1   :  { %v554_v56 = vsub.f32 1.5, %v553_v44  ;;  %v583_v26 = vmul.f32 %v549_v47, %v49_v37  ;;  %v54_v37 = vld [vmem:[%s1262_s5 + $0xf0] sm:$0xff]  ;;  %vm498_vm6 = vmor %vm496_vm5, %vm497_vm4  ;;  %v60_v62 = vld [vmem:[%s1262_s5 + $0x120] sm:$0xff]  ;;  %vm688_vm7 = vcmask 523264  }
 0x2e2   :  { %v485_v38 = vadd.f32 1e-05, %v477_v46  ;;  %v843_v57 = vpop.eup %842  ;;  %v494_v25 = vsub.f32 1.5, %v493_v14  ;;  %v52_v46 = vld [vmem:[%s1262_s5 + $0xe0] sm:$0xff] }
 0x2e3   :  { %613 = vperm.xlu2 %823, %v583_v26   ;;  %v555_v58 = vmul.f32 %v839_v11, %v554_v56  ;;  %v501_v59 = vmul.f32 %v843_v57, %v483_v19  ;;  %vm507_vm11 = vweird.f32 %v843_v57  ;;  %v662_v47 = vpop.permute.xlu2 %661  ;;  %v577_v56 = vsub.f32 %v1079_v28, %v1126_v3 }
 0x2e4   :  { %846 = vrsqrt.f32 %v485_v38  ;;  %vm508_vm14 = vmor %vm506_vm12, %vm507_vm11  ;;  %vm526_vm2 = vweird.f32 %v485_v38  ;;  %v495_v36 = vmul.f32 %v1186_v43, %v494_v25  ;;  %v574_v28 = vsub.f32 %v1076_v27, %v1130_v54 }
 0x2e5   :  { %v845_v60 = vpop.eup %844  ;;  %v559_v63 = vsel %vm558_vm10, %v839_v11, %v555_v58  ;;  %v502_v61 = vmul.f32 %v843_v57, %v501_v59  ;;  %vm754_vm11 = vcmask 64512  }
 0x2e6   :  { %v511_v1 = vmul.f32 %v845_v60, %v484_v33  ;;  %v584_v2 = vmul.f32 %v559_v63, %v50_v52  ;;  %vm517_vm13 = vweird.f32 %v845_v60  ;;  %v499_v44 = vsel %vm498_vm6, %v1186_v43, %v495_v36 }
 0x2e7   :  { %v503_v5 = vmul.f32 0.5, %v502_v61  ;;  %vm518_vm0 = vmor %vm516_vm15, %vm517_vm13  ;;  %v578_v45 = vmul.f32 %v499_v44, %v44_v42  ;;  %v575_v63 = vsub.f32 %v1084_v35, %v1132_v29  ;;  %v576_v61 = vsub.f32 %v1087_v41, %v1140_v15  ;;  %v61_v42 = vld [vmem:[%s1262_s5 + $0x128] sm:$0xff] }
 0x2e8   :  { %v512_v20 = vmul.f32 %v845_v60, %v511_v1  ;;  %618 = vperm.xlu1 %822, %v584_v2   ;;  %v573_v35 = vsub.f32 %v1102_v53, %v1170_v16  ;;  %v572_v15 = vsub.f32 %v1099_v51, %v1156_v55  ;;  %v570_v53 = vsub.f32 %v1071_v18, %v1134_v8  ;;  %v682_v55 = vld [vmem:[%s1260_s3] sm:$0xff] }
 0x2e9   :  { %v504_v23 = vsub.f32 1.5, %v503_v5 }
 0x2ea   :  { %v847_v50 = vpop.eup %846  ;;  %v513_v39 = vmul.f32 0.5, %v512_v20 }
 0x2eb   :  { %v521_v6 = vmul.f32 %v847_v50, %v485_v38  ;;  %v505_v9 = vmul.f32 %v843_v57, %v504_v23  ;;  %vm527_vm1 = vweird.f32 %v847_v50  ;;  %v657_v52 = vpop.permute.xlu1 %656 }
 0x2ec   :  { %v514_v0 = vsub.f32 1.5, %v513_v39  ;;  %vm528_vm3 = vmor %vm526_vm2, %vm527_vm1 }
 0x2ed   :  { %v522_v10 = vmul.f32 %v847_v50, %v521_v6  ;;  %v509_v11 = vsel %vm508_vm14, %v843_v57, %v505_v9  ;;  %v672_v57 = vpop.permute.xlu0 %671  ;;  %v571_v6 = vsub.f32 %v1094_v48, %v1152_v49 }
 0x2ee   :  { %v515_v13 = vmul.f32 %v845_v60, %v514_v0  ;;  %v579_v21 = vmul.f32 %v509_v11, %v45_v7 }
 0x2ef   :  { %v523_v17 = vmul.f32 0.5, %v522_v10 }
 0x2f0   :  { %v519_v19 = vsel %vm518_vm0, %v845_v60, %v515_v13  ;;  %593 = vperm.xlu1 %822, %v579_v21  }
 0x2f1   :  { %v524_v22 = vsub.f32 1.5, %v523_v17  ;;  %v580_v24 = vmul.f32 %v519_v19, %v46_v12 }
 0x2f3   :  { %598 = vperm.xlu2 %823, %v580_v24   ;;  %v525_v31 = vmul.f32 %v847_v50, %v524_v22 }
 0x2f5   :  { %v529_v32 = vsel %vm528_vm3, %v847_v50, %v525_v31  ;;  %v667_v59 = vpop.permute.xlu0 %666 }
 0x2f6   :  { %v581_v33 = vmul.f32 %v529_v32, %v47_v30 }
 0x2f8   :  { %603 = vperm.xlu0 %821, %v581_v33   ;;  %641 = vperm.xlu1 %822, %v53_v34  }
 0x2fb   :  { %646 = vperm.xlu2 %823, %v54_v37  }
 0x2fd   :  { %v652_v23 = vpop.permute.xlu0 %651 }
 0x300   :  { %588 = vperm.xlu0 %821, %v578_v45  }
 0x303   :  { %636 = vperm.xlu2 %823, %v52_v46  }
 0x308   :  { %685 = vperm.xlu0 %821, %v60_v62   ;;  %v62_v62 = vld [vmem:[%s1262_s5 + $0x130] sm:$0xff] }
 0x332   :  { %v624_v26 = vpop.permute.xlu2 %623 }
 0x333   :  { %v633_v38 = vmul.f32 %v624_v26, %v577_v56 }
 0x335   :  { %v681_v43 = vadd.f32 %v672_v57, %v633_v38 }
 0x337   :  { %700 = vmatpush.msrb.mxu2 %v681_v43 }
 0x33d   :  { %v614_v60 = vpop.permute.xlu2 %613 }
 0x33e   :  { %v631_v2 = vmul.f32 %v614_v60, %v575_v63 }
 0x340   :  { %v679_v50 = vadd.f32 %v662_v47, %v631_v2  ;;  %v63_v47 = vld [vmem:[%s1262_s5 + $0x138] sm:$0xf]  ;;  %s787_s5 = sshll.u32 %s1263_s6, 4  ;;  %s788_s5 = int_to_ptr.hbm [resolvable:$true] %s787_s5 }
 0x34d   :  { %v599_v20 = vpop.permute.xlu2 %598 }
 0x34e   :  { %v628_v54 = vmul.f32 %v599_v20, %v572_v15 }
 0x352   :  { %v609_v58 = vpop.permute.xlu1 %608 }
 0x353   :  { %v630_v4 = vmul.f32 %v609_v58, %v574_v28 }
 0x355   :  { %v678_v39 = vadd.f32 %v657_v52, %v630_v4  ;;  %v647_v41 = vpop.permute.xlu2 %646  ;;  %v748_v52 = vld [vmem:[%s1261_s4] sm:$0xf] }
 0x356   :  { %v676_v9 = vadd.f32 %v647_v41, %v628_v54 }
 0x35a   :  { %v619_v1 = vpop.permute.xlu1 %618 }
 0x35b   :  { %v632_v3 = vmul.f32 %v619_v1, %v576_v61 }
 0x35d   :  { %v680_v5 = vadd.f32 %v667_v59, %v632_v3  ;;  %v637_v13 = vpop.permute.xlu2 %636 }
 0x35f   :  { %701 = vmatpush.msrb.mxu2 %v680_v5 }
 0x361   :  { %702 = vmatpush.msrb.mxu2 %v679_v50 }
 0x362   :  { %v594_v40 = vpop.permute.xlu1 %593 }
 0x363   :  { %703 = vmatpush.msrb.mxu2 %v678_v39  ;;  %v627_v10 = vmul.f32 %v594_v40, %v571_v6 }
 0x36a   :  { %v604_v29 = vpop.permute.xlu0 %603  ;;  %v642_v7 = vpop.permute.xlu1 %641 }
 0x36b   :  { %v629_v27 = vmul.f32 %v604_v29, %v573_v35  ;;  %v675_v11 = vadd.f32 %v642_v7, %v627_v10 }
 0x36d   :  { %v677_v0 = vadd.f32 %v652_v23, %v629_v27 }
 0x36f   :  { %704 = vmatpush.msrb.mxu2 %v677_v0 }
 0x371   :  { %705 = vmatpush.msrb.mxu2 %v676_v9 }
 0x372   :  { %v589_v16 = vpop.permute.xlu0 %588 }
 0x373   :  { %v626_v12 = vmul.f32 %v589_v16, %v570_v53  ;;  %706 = vmatpush.msrb.mxu2 %v675_v11 }
 0x375   :  { %v674_v51 = vadd.f32 %v637_v13, %v626_v12 }
 0x377   :  { %707 = vmatpush.msrb.mxu2 %v674_v51 }
 0x378   :  { %809 = vmatmul.msk.f32.vlgmr.msrb.gmra.mxu2 %vm688_vm7, %v682_v55 }
 0x37a   :  { %v686_v48 = vpop.permute.xlu0 %685 }
 0x3fb   :  { %v709_v49 = vpop.f32.mrf.mxu2 }
 0x3fc   :  { %v710_v14 = vadd.f32 %v709_v49, %v686_v48 }
 0x3fe   :  { %v712_v17 = vmax.f32 %v710_v14, 0.0 }
 0x400   :  { %713 = vadd.xlane.f32.xlu1 %v712_v17  ;;  %v715_v21 = vmul.f32 %v712_v17, %v712_v17 }
 0x402   :  { %716 = vadd.xlane.f32.xlu2 %v715_v21 }
 0x473   :  { %v714_v18 = vpop.xlane.xlu1 %713 }
 0x474   :  { %v718_v8 = vmul.f32 0.0078125, %v714_v18 }
 0x475   :  { %v717_v19 = vpop.xlane.xlu2 %716 }
 0x476   :  { %v720_v22 = vmul.f32 %v718_v8, %v718_v8  ;;  %v719_v24 = vmul.f32 0.0078125, %v717_v19  ;;  %v734_v26 = vsub.f32 %v712_v17, %v718_v8 }
 0x478   :  { %v721_v25 = vsub.f32 %v719_v24, %v720_v22 }
 0x47a   :  { %v722_v30 = vmax.f32 %v721_v25, 0.0 }
 0x47c   :  { %v723_v31 = vadd.f32 1e-05, %v722_v30 }
 0x47e   :  { %848 = vrsqrt.f32 %v723_v31  ;;  %vm730_vm9 = vweird.f32 %v723_v31 }
 0x484   :  { %v849_v32 = vpop.eup %848 }
 0x485   :  { %v725_v33 = vmul.f32 %v849_v32, %v723_v31  ;;  %vm731_vm8 = vweird.f32 %v849_v32 }
 0x486   :  { %vm732_vm10 = vmor %vm730_vm9, %vm731_vm8 }
 0x487   :  { %v726_v34 = vmul.f32 %v849_v32, %v725_v33 }
 0x489   :  { %v727_v36 = vmul.f32 0.5, %v726_v34 }
 0x48b   :  { %v728_v37 = vsub.f32 1.5, %v727_v36 }
 0x48d   :  { %v729_v44 = vmul.f32 %v849_v32, %v728_v37 }
 0x48f   :  { %v733_v45 = vsel %vm732_vm10, %v849_v32, %v729_v44 }
 0x490   :  { %v735_v46 = vmul.f32 %v733_v45, %v61_v42 }
 0x492   :  { %738 = vperm.xlu0 %821, %v735_v46  }
 0x49a   :  { %744 = vperm.xlu0 %821, %v62_v62  }
 0x4a2   :  { %751 = vperm.xlu0 %821, %v63_v47  }
 0x504   :  { %v739_v56 = vpop.permute.xlu0 %738 }
 0x505   :  { %v741_v38 = vmul.f32 %v739_v56, %v734_v26 }
 0x50c   :  { %v745_v57 = vpop.permute.xlu0 %744 }
 0x50d   :  { %v747_v43 = vadd.f32 %v745_v57, %v741_v38 }
 0x50f   :  { %773 = vmatpush.msrb.mxu3 %v747_v43 }
 0x510   :  { %810 = vmatmul.msk.f32.vlgmr.msrb.gmra.mxu3 %vm754_vm11, %v748_v52 }
 0x514   :  { %v752_v58 = vpop.permute.xlu0 %751 }
 0x593   :  { %v775_v59 = vpop.f32.mrf.mxu3 }
 0x594   :  { %v776_v60 = vadd.f32 %v775_v59, %v752_v58 }
 0x596   :  { %v778_v63 = vmax.f32 %v776_v60, 0.0 }
 0x598   :  { %779 = vst [vmem:[#allocation2] sm:$0xf] %v778_v63 }
 0x599   :  { %790 = dma.vmem_to_hbm [thread:$0]  %s786_s27, 64, %s788_s5, [#allocation3]  }
 0x59a   :  { %874 = dma.done.wait [#allocation3], 64  }
 0x59b   :  { %875 = vsyncadd [#allocation3], 4294967232 }
 0x59c   :  { %795 = vsyncpa [#allocation3], 1 }

</bundles_post_ra>
